<compile_context>
chip_gen: v6e
topology: v6e:2x2x1
jax: 0.10.0
libtpu: 0.0.40
codegen_flags: <defaults>
</compile_context>

<pallas_src>
import jax
import jax.numpy as jnp
from jax.experimental import pallas as pl
from jax.experimental.pallas import tpu as pltpu

LANE = 128


# ---------------------------------------------------------------------------
# Pallas kernel: one fused GEMM (conv taps + BN shift via constant-1 row) + ReLU6
# ---------------------------------------------------------------------------
def conv_bn_relu6_kernel(w_ref, vt_ref, o_ref):
    # w_ref:  [Cout, K+1]    bf16  BN-scale-folded 3x3 taps (row order kh,kw,cin) + shift col
    # vt_ref: [K+1, TILE_L]  bf16  stride-2 phase rows + constant-1 row, spatial in lanes
    # o_ref:  [Cout, TILE_L] bf16  channel-major (NCHW) output tile, lane-dense
    y = jnp.dot(w_ref[...], vt_ref[...], preferred_element_type=jnp.float32)
    o_ref[...] = jnp.clip(y, 0.0, 6.0).astype(o_ref.dtype)   # ReLU6: f32 math, bf16 store


def _pick_tile_lanes(total_lanes, max_lanes=8192):
    """Largest divisor of total_lanes that is a multiple of 128 and <= max_lanes."""
    if total_lanes % LANE != 0:
        return total_lanes            # ragged tiny input: single (possibly masked) block
    q = total_lanes // LANE
    best = 1
    for d in range(1, q + 1):
        if q % d == 0 and d * LANE <= max_lanes:
            best = d
    return best * LANE


# ---------------------------------------------------------------------------
# Wrapper: phase-split layout prep + pallas_call
# ---------------------------------------------------------------------------
def shallow_mobilenet_forward(x_nchw, conv_w, gamma, beta, run_mean, run_var,
                              eps=1e-5, compute_dtype=jnp.bfloat16):
    """x_nchw: [N, 3, H, W] f32; conv_w: [32, 3, 3, 3] OIHW. Returns [N, 32, Ho, Wo] bf16."""
    N, Cin, H, W = x_nchw.shape
    Cout = conv_w.shape[0]
    Ho, Wo = (H + 1) // 2, (W + 1) // 2           # stride 2, pad 1, k 3
    M = Ho * Wo
    K = 9 * Cin                                   # 27
    KB = K + 1                                    # +1 constant-1 row carrying the BN shift

    # --- fuse BatchNorm: y = conv(x)*scale + shift. Scale folded into the weights, the
    #     shift folded into the GEMM as (extra weight column) x (constant-1 row). --------
    scale = gamma / jnp.sqrt(run_var + eps)
    shift = beta - run_mean * scale
    w_f = conv_w.astype(jnp.float32) * scale[:, None, None, None]        # [Cout,Cin,3,3]
    w_mat = jnp.transpose(w_f, (0, 2, 3, 1)).reshape(Cout, K)            # (kh, kw, cin)
    w_full = jnp.concatenate([w_mat, shift[:, None]], axis=1).astype(compute_dtype)

    # --- bf16 first, then pad + 9 stride-2 phase views ---------------------------------
    #     V[kh,kw][n, c, oh, ow] = x_pad[n, c, 2*oh + kh, 2*ow + kw]
    x_q = x_nchw.astype(compute_dtype)
    x_pad = jnp.pad(x_q, ((0, 0), (0, 0), (1, 2 * Ho - H), (1, 2 * Wo - W)))
    views = [x_pad[:, :, kh:kh + 2 * Ho - 1:2, kw:kw + 2 * Wo - 1:2]
             for kh in range(3) for kw in range(3)]
    vt = jnp.stack(views, axis=1).reshape(N, K, M)                       # [N, 27, M]
    vt = jnp.concatenate([vt, jnp.ones((N, 1, M), dtype=compute_dtype)],
                         axis=1)                                         # [N, 28, M]

    # --- lane-dense grouping / tiling ---------------------------------------------------
    # Big inputs: one image per group, spatial tiled in 128-multiples (grid = (N, T)).
    # Small inputs (M not a multiple of 128): pack G images per group so the output
    # store width is a multiple of 128.
    if M % LANE == 0:
        G = 1
    else:
        G = N
        for d in range(1, N + 1):
            if N % d == 0 and (d * M) % LANE == 0:
                G = d
                break
    NG = N // G
    L = G * M
    if G == 1:
        vt_g = vt                                                        # [N, KB, M]
    else:
        vt_g = (vt.reshape(NG, G, KB, M).transpose(0, 2, 1, 3)
                  .reshape(NG, KB, L))                                   # [NG, KB, G*M]
    tile_l = _pick_tile_lanes(L)
    T = L // tile_l

    # advisory cost (vt pads 28 -> 32 sublanes in the bf16 tiled HBM/VMEM layout)
    cost = pl.CostEstimate(
        flops=2 * NG * L * KB * Cout,
        transcendentals=0,
        bytes_accessed=(NG * 32 * L * 2) + (Cout * 32 * 2) + (NG * Cout * L * 2),
    )

    out = pl.pallas_call(
        conv_bn_relu6_kernel,
        out_shape=jax.ShapeDtypeStruct((NG, Cout, L), jnp.bfloat16),
        grid=(NG, T),
        in_specs=[
            pl.BlockSpec((Cout, KB), lambda n, t: (0, 0)),               # weights resident
            pl.BlockSpec((None, KB, tile_l), lambda n, t: (n, 0, t)),    # phase rows
        ],
        out_specs=pl.BlockSpec((None, Cout, tile_l), lambda n, t: (n, 0, t)),
        compiler_params=pltpu.CompilerParams(
            dimension_semantics=("parallel", "parallel"),    # images x spatial tiles
            vmem_limit_bytes=12 * 1024 * 1024,               # few-MiB working set; v7x-safe
        ),
        cost_estimate=cost,
    )(w_full, vt_g)

    if G == 1:
        return out.reshape(N, Cout, Ho, Wo)                  # already NCHW order (free)
    # tiny inputs only: ungroup the packed images (negligible bytes at these sizes)
    return (out.reshape(NG, Cout, G, M).transpose(0, 2, 1, 3)
               .reshape(N, Cout, Ho, Wo))


# ---------------------------------------------------------------------------
# Pure-JAX reference (mirrors the kernel's intentional bf16 quantization)
# ---------------------------------------------------------------------------
def reference_forward(x_nchw, conv_w, gamma, beta, run_mean, run_var,
                      eps=1e-5, compute_dtype=jnp.bfloat16):
    scale = gamma / jnp.sqrt(run_var + eps)
    shift = (beta - run_mean * scale).astype(compute_dtype).astype(jnp.float32)
    w_f = (conv_w * scale[:, None, None, None]).astype(compute_dtype).astype(jnp.float32)
    x_q = x_nchw.astype(compute_dtype).astype(jnp.float32)
    y = jax.lax.conv_general_dilated(
        x_q, w_f, window_strides=(2, 2), padding=((1, 1), (1, 1)),
        dimension_numbers=("NCHW", "OIHW", "NCHW"),
        precision=jax.lax.Precision.HIGHEST)
    y = y + shift[None, :, None, None]
    return jnp.clip(y, 0.0, 6.0)


if __name__ == "__main__":
    key = jax.random.PRNGKey(0)
    k_x, k_w, k_g, k_b, k_m, k_v = jax.random.split(key, 6)

    # Small input consistent with the module's 3-channel stem: [2, 3, 16, 16].
    N, Cin, H, W = 2, 3, 16, 16
    Cout = 32

    x = jax.random.normal(k_x, (N, Cin, H, W), dtype=jnp.float32)
    conv_w = 0.1 * jax.random.normal(k_w, (Cout, Cin, 3, 3), dtype=jnp.float32)
    gamma = 1.0 + 0.1 * jax.random.normal(k_g, (Cout,), dtype=jnp.float32)
    beta = 0.1 * jax.random.normal(k_b, (Cout,), dtype=jnp.float32)
    run_mean = 0.1 * jax.random.normal(k_m, (Cout,), dtype=jnp.float32)
    run_var = 1.0 + 0.1 * jnp.abs(jax.random.normal(k_v, (Cout,), dtype=jnp.float32))

    fwd = jax.jit(shallow_mobilenet_forward)
    out = jax.block_until_ready(fwd(x, conv_w, gamma, beta, run_mean, run_var))
    assert out.shape == (N, Cout, (H + 1) // 2, (W + 1) // 2), out.shape

    # Compare against the reference quantized the same way (bf16 operands + bf16 store);
    # tolerance covers at most 1 bf16 ulp of disagreement near 6.0 from f32 sum ordering.
    ref = reference_forward(x, conv_w, gamma, beta, run_mean, run_var)
    ref_q = ref.astype(jnp.bfloat16).astype(jnp.float32)
    out_f = out.astype(jnp.float32)
    max_err = float(jnp.max(jnp.abs(out_f - ref_q)))
    assert jnp.allclose(out_f, ref_q, atol=5e-2, rtol=2e-2), f"mismatch vs reference: {max_err}"

    print("KERNEL_OK")
</pallas_src>

<mosaic_0001>
module attributes {stable_mosaic.version = 11 : i64} {
  func.func @conv_bn_relu6_kernel(%arg0: i32, %arg1: i32, %arg2: memref<32x28xbf16, #tpu.memory_space<vmem>>, %arg3: memref<1x28x128xbf16, #tpu.memory_space<vmem>>, %arg4: memref<1x32x128xbf16, #tpu.memory_space<vmem>>) attributes {dimension_semantics = [#tpu.dimension_semantics<parallel>, #tpu.dimension_semantics<parallel>], iteration_bounds = array<i64: 1, 1>, scalar_prefetch = 0 : i64, scratch_operands = 0 : i64, tpu.core_type = #tpu.core_type<tc>, window_params = [{pipeline_mode = #tpu.pipeline_mode<synchronous>, transform_indices = @transform_0, window_bounds = array<i64: 32, 28>}, {transform_indices = @transform_1, window_bounds = array<i64: 1, 28, 128>}, {transform_indices = @transform_2, window_bounds = array<i64: 1, 32, 128>}]} {
    %c0 = arith.constant 0 : index
    %c0_0 = arith.constant 0 : index
    %0 = vector.load %arg2[%c0, %c0_0] : memref<32x28xbf16, #tpu.memory_space<vmem>>, vector<32x28xbf16>
    %c0_1 = arith.constant 0 : index
    %c0_2 = arith.constant 0 : index
    %c0_3 = arith.constant 0 : index
    %1 = vector.load %arg3[%c0_1, %c0_2, %c0_3] : memref<1x28x128xbf16, #tpu.memory_space<vmem>>, vector<1x28x128xbf16>
    %2 = vector.shape_cast %1 : vector<1x28x128xbf16> to vector<28x128xbf16>
    %cst = arith.constant dense<0.000000e+00> : vector<32x128xf32>
    %3 = tpu.matmul %0, %2, %cst {dimension_numbers = #tpu.dot_dimension_numbers<[1], [0], [0], [1], [0, 0, 1, 1], [], []>} : vector<32x28xbf16>, vector<28x128xbf16>, vector<32x128xf32> -> vector<32x128xf32>
    %cst_4 = arith.constant 0.000000e+00 : f32
    %cst_5 = arith.constant 6.000000e+00 : f32
    %4 = vector.broadcast %cst_4 : f32 to vector<32x128xf32>
    %5 = arith.maximumf %4, %3 : vector<32x128xf32>
    %6 = vector.broadcast %cst_5 : f32 to vector<32x128xf32>
    %7 = arith.minimumf %6, %5 : vector<32x128xf32>
    %8 = arith.truncf %7 : vector<32x128xf32> to vector<32x128xbf16>
    %c0_6 = arith.constant 0 : index
    %c0_7 = arith.constant 0 : index
    %c0_8 = arith.constant 0 : index
    %9 = vector.load %arg4[%c0_6, %c0_7, %c0_8] : memref<1x32x128xbf16, #tpu.memory_space<vmem>>, vector<1x32x128xbf16>
    %10 = vector.shape_cast %9 : vector<1x32x128xbf16> to vector<32x128xbf16>
    %11 = vector.shape_cast %8 : vector<32x128xbf16> to vector<1x32x128xbf16>
    tpu.vector_store %arg4[%c0_6, %c0_7, %c0_8], %11 {strides = array<i32>} : memref<1x32x128xbf16, #tpu.memory_space<vmem>>, vector<1x32x128xbf16>,
    return
  }
  func.func @transform_0(%arg0: i32, %arg1: i32) -> (i32, i32) {
    %c0_i32 = arith.constant 0 : i32
    %c0_i32_0 = arith.constant 0 : i32
    %c0_i32_1 = arith.constant 0 : i32
    return %c0_i32, %c0_i32_0 : i32, i32
  }
  func.func @transform_1(%arg0: i32, %arg1: i32) -> (i32, i32, i32) {
    %c0_i32 = arith.constant 0 : i32
    %c0_i32_0 = arith.constant 0 : i32
    return %arg0, %c0_i32, %arg1 : i32, i32, i32
  }
  func.func @transform_2(%arg0: i32, %arg1: i32) -> (i32, i32, i32) {
    %c0_i32 = arith.constant 0 : i32
    %c0_i32_0 = arith.constant 0 : i32
    return %arg0, %c0_i32, %arg1 : i32, i32, i32
  }
}

</mosaic_0001>

<bundles_post_ra>
// kernel: shallow_mobilenet_forward.1
= control target key start
LH: loop header
LB: loop body
LE: loop exit
PB: predicated region body
PF: predicated region fallthrough
CT: control target
= control target key end

     0   :  { %vm48_vm0 = vcmask 1045504   ;;  %vm41_vm1 = vcmask 228352   ;;  %s208_s1 = inlined_call_operand.vmem [shape: bf16[1,28,128], index: 1, kind: input, shape index: {}]   ;;  %s209_s0 = inlined_call_operand.vmem [shape: bf16[32,28], index: 0, kind: input, shape index: {}]   ;;  %s210_s2 = inlined_call_operand.vmem [shape: bf16[1,32,128], index: 2, kind: output, shape index: {}]  }
   0x1   :  { %v171_v0 = vld [vmem:[%s208_s1 + $0x8] sm:$0x3f]   ;;  %v172_v1 = vld [vmem:[%s208_s1] sm:$0xff]  }
   0x2   :  { %170 = vmatprep.subr.msk.bf16.mxu0 %vm48_vm0, %v171_v0  ;;  %v50_v2 = vsel %vm48_vm0, %v171_v0, 0  ;;  %v173_v3 = vld [vmem:[%s209_s0] sm:$0xff]   ;;  %v174_v4 = vld [vmem:[%s209_s0 + $0x8] sm:$0xff]  }
   0x3   :  { %163 = vmatpush3.bf16.msra.mxu0 %v50_v2  ;;  %166 = vmatprep.mubr.msk.bf16.mxu0 %vm41_vm1, %v173_v3 }
   0x4   :  { %164 = vmatprep.subr.bf16.mxu0 %v172_v1 }
   0x7   :  { %165 = vmatpush3.bf16.msra.mxu0 %v172_v1 }
   0xa   :  { %167 = vmatmul.mubr.msk.bf16.vlgmr.msra.gmra.mxu0 %vm41_vm1, %v174_v4 }
  0xca   :  { %v168_v5 = vpop.f32.mrf.mxu0 }
  0xcb   :  { %v103_v7 = vmax.f32 %v168_v5, 0.0 }
  0xcc   :  { %v86_v6 = vpop.f32.mrf.mxu0 }
  0xcd   :  { %v101_v9 = vmax.f32 %v86_v6, 0.0  ;;  %v107_v12 = vmin.f32 %v103_v7, 6.0 }
  0xce   :  { %v169_v8 = vpop.f32.mrf.mxu0 }
  0xcf   :  { %v104_v10 = vmax.f32 %v169_v8, 0.0  ;;  %v105_v15 = vmin.f32 %v101_v9, 6.0 }
  0xd0   :  { %v89_v11 = vpop.f32.mrf.mxu0 }
  0xd1   :  { %v108_v13 = vmin.f32 %v104_v10, 6.0  ;;  %v102_v14 = vmax.f32 %v89_v11, 0.0 }
  0xd3   :  { %v155_v16 = vpack.c.bf16 %v108_v13, %v107_v12  ;;  %v106_v17 = vmin.f32 %v102_v14, 6.0 }
  0xd5   :  { %157 = vst [vmem:[%s210_s2 + $0x8] sm:$0xff] %v155_v16   ;;  %v150_v18 = vpack.c.bf16 %v106_v17, %v105_v15 }
  0xd7   :  { %151 = vst [vmem:[%s210_s2] sm:$0xff] %v150_v18  }

</bundles_post_ra>
